<compile_context>
chip_gen: v5e
topology: v5e:2x2
jax: 0.10.0
libtpu: 0.0.40
codegen_flags: <defaults>
</compile_context>

<pallas_src>
import jax
import jax.numpy as jnp
from jax.experimental import pallas as pl
from jax.experimental.pallas import tpu as pltpu


def _conv_bn_relu_kernel(x_ref, w_ref, b_ref, o_ref):
    # x_ref: (1, h_tile, KH*W*C_in)      bf16  im2col rows for this output tile
    # w_ref: (KH*W*C_in, W_out*C_out)    bf16  block-Toeplitz conv weight (BN folded)
    # b_ref: (1, W_out*C_out)            f32   folded BN bias, tiled across W_out
    # o_ref: (1, h_tile, W_out*C_out)    bf16  output row tile
    acc = jnp.dot(x_ref[0], w_ref[...], preferred_element_type=jnp.float32)
    y = jnp.maximum(acc + b_ref[0, :], 0.0)           # fused BN bias + ReLU
    o_ref[0, :, :] = y.astype(o_ref.dtype)


def conv_bn_relu(x_nchw, weight_oihw, gamma, beta, running_mean, running_var,
                 *, stride=1, padding=1, eps=1e-5):
    """Eval-mode ConvBNReLU forward. Input x is NCHW (PyTorch); returns NHWC bf16."""
    n, c_in, h, w = x_nchw.shape
    c_out, c_in_w, kh, kw = weight_oihw.shape
    assert c_in == c_in_w

    h_out = (h + 2 * padding - kh) // stride + 1
    w_out = (w + 2 * padding - kw) // stride + 1
    wc_in = w * c_in
    wc_out = w_out * c_out
    k_dim = kh * wc_in

    # ---- glue: BN folding + banded block-Toeplitz weight (tiny, one-time) ----
    scale = gamma / jnp.sqrt(running_var + eps)
    bias = (beta - running_mean * scale).astype(jnp.float32)
    # fold BN scale into the conv weights (per output channel), OIHW -> HWIO
    w_hwio = jnp.transpose(weight_oihw * scale[:, None, None, None],
                           (2, 3, 1, 0))                 # (KH, KW, C_in, C_out)

    # wt[kh, iw, ci, ow, co] = w[kh, kw, ci, co] iff iw == ow*stride + kw - padding
    # (zero otherwise -- this also encodes the width zero-padding and stride).
    kw_idx = jnp.arange(kw)[:, None, None]
    iw_idx = jnp.arange(w)[None, :, None]
    ow_idx = jnp.arange(w_out)[None, None, :]
    ind = (iw_idx == ow_idx * stride + kw_idx - padding).astype(w_hwio.dtype)
    wt = jnp.einsum('kio,hkcd->hicod', ind, w_hwio)      # (KH, W, C_in, W_out, C_out)
    wt = wt.reshape(k_dim, wc_out).astype(jnp.bfloat16)  # K ordered (kh, iw, ci)

    bias_tiled = jnp.tile(bias, (w_out,)).reshape(1, wc_out)   # [ow*C_out+co]=bias[co]

    # ---- glue: activation layout (NCHW -> collapsed NHWC -> H-im2col) --------
    x_coll = jnp.transpose(x_nchw, (0, 2, 3, 1)).reshape(n, h, wc_in)
    x_pad = jnp.pad(x_coll, ((0, 0), (padding, padding), (0, 0)))  # pad H only
    # im2col over H: row ho holds padded rows [ho*stride + k, k=0..KH-1] concatenated
    taps = [x_pad[:, k0: k0 + (h_out - 1) * stride + 1: stride, :] for k0 in range(kh)]
    x_im2col = jnp.stack(taps, axis=2).reshape(n, h_out, k_dim).astype(jnp.bfloat16)

    # ---- tiling --------------------------------------------------------------
    # largest multiple-of-8 divisor of h_out, capped at 256; fall back to one
    # full-height tile if h_out isn't a multiple of 8 (still correct: full dim).
    h_tile = h_out
    if h_out % 8 == 0:
        h_tile = 8
        cand = 8
        while cand <= min(h_out, 256):
            if h_out % cand == 0:
                h_tile = cand
            cand += 8
    grid = (n, h_out // h_tile)

    cost = pl.CostEstimate(
        flops=2 * n * h_out * k_dim * wc_out,
        transcendentals=0,
        bytes_accessed=(n * h_out * k_dim * 2        # bf16 im2col in
                        + k_dim * wc_out * 2         # bf16 weights
                        + wc_out * 4                 # f32 bias
                        + n * h_out * wc_out * 2))   # bf16 out

    out = pl.pallas_call(
        _conv_bn_relu_kernel,
        out_shape=jax.ShapeDtypeStruct((n, h_out, wc_out), jnp.bfloat16),
        grid_spec=pltpu.PrefetchScalarGridSpec(
            num_scalar_prefetch=0,
            grid=grid,
            in_specs=[
                pl.BlockSpec((1, h_tile, k_dim), lambda b, t: (b, t, 0)),
                pl.BlockSpec((k_dim, wc_out), lambda b, t: (0, 0)),
                pl.BlockSpec((1, wc_out), lambda b, t: (0, 0)),
            ],
            out_specs=pl.BlockSpec((1, h_tile, wc_out), lambda b, t: (b, t, 0)),
        ),
        compiler_params=pltpu.CompilerParams(
            dimension_semantics=("parallel", "parallel")),
        cost_estimate=cost,
    )(x_im2col, wt, bias_tiled)

    # free reshape back to NHWC (N, H_out, W_out, C_out)
    return out.reshape(n, h_out, w_out, c_out)


def _reference(x_nchw, weight_oihw, gamma, beta, running_mean, running_var,
               *, stride=1, padding=1, eps=1e-5, round_operands_to_bf16=False):
    """Pure-JAX reference (lax conv).  With round_operands_to_bf16=True it uses
    the same bf16-rounded operands as the kernel (tight check); with False it
    is the exact f32 module semantics (loose check)."""
    scale = gamma / jnp.sqrt(running_var + eps)
    bias = beta - running_mean * scale
    w = weight_oihw * scale[:, None, None, None]
    xx = x_nchw
    if round_operands_to_bf16:
        xx = xx.astype(jnp.bfloat16).astype(jnp.float32)
        w = w.astype(jnp.bfloat16).astype(jnp.float32)
    y = jax.lax.conv_general_dilated(
        xx.astype(jnp.float32), w.astype(jnp.float32),
        window_strides=(stride, stride),
        padding=((padding, padding), (padding, padding)),
        dimension_numbers=("NCHW", "OIHW", "NCHW"),
        precision=jax.lax.Precision.HIGHEST)
    y = y + bias[None, :, None, None]
    return jnp.maximum(y, 0.0)


if __name__ == "__main__":
    # small shapes consistent with the module
    N, C_IN, H, W = 2, 4, 16, 16
    C_OUT, KS, PAD = 8, 3, 1

    key = jax.random.PRNGKey(0)
    kx, kw_key = jax.random.split(key)

    x = jax.random.normal(kx, (N, C_IN, H, W), dtype=jnp.float32)

    # kaiming_normal_(a=1): gain = sqrt(2/(1+1^2)) = 1, std = 1/sqrt(fan_in)
    fan_in = C_IN * KS * KS
    weight = jax.random.normal(kw_key, (C_OUT, C_IN, KS, KS),
                               dtype=jnp.float32) / jnp.sqrt(float(fan_in))

    # BatchNorm2d default parameters / running stats (eval mode)
    gamma = jnp.ones((C_OUT,), jnp.float32)
    beta = jnp.zeros((C_OUT,), jnp.float32)
    running_mean = jnp.zeros((C_OUT,), jnp.float32)
    running_var = jnp.ones((C_OUT,), jnp.float32)

    ok = True
    for stride in (1, 2):   # stride=1 (module default) and stride=2 (now exercised)
        out = conv_bn_relu(x, weight, gamma, beta, running_mean, running_var,
                           stride=stride, padding=PAD)
        out = jax.block_until_ready(out)
        out_f32 = out.astype(jnp.float32)

        # tight: identical bf16-rounded operands (kernel adds only bf16 output rounding)
        ref_tight = _reference(x, weight, gamma, beta, running_mean, running_var,
                               stride=stride, padding=PAD,
                               round_operands_to_bf16=True)
        # loose: exact f32 module semantics
        ref_loose = _reference(x, weight, gamma, beta, running_mean, running_var,
                               stride=stride, padding=PAD,
                               round_operands_to_bf16=False)
        ref_tight = jnp.transpose(ref_tight, (0, 2, 3, 1))
        ref_loose = jnp.transpose(ref_loose, (0, 2, 3, 1))

        ok &= out.shape == ref_loose.shape
        ok &= float(jnp.max(jnp.abs(out_f32 - ref_tight))) < 3e-2   # bf16 output rounding
        ok &= float(jnp.max(jnp.abs(out_f32 - ref_loose))) < 8e-2   # + bf16 operand rounding

    assert ok
    print("KERNEL_OK")
</pallas_src>

<mosaic_0001>
module attributes {stable_mosaic.version = 11 : i64} {
  func.func @_conv_bn_relu_kernel(%arg0: i32, %arg1: i32, %arg2: memref<1x16x192xbf16, #tpu.memory_space<vmem>>, %arg3: memref<192x128xbf16, #tpu.memory_space<vmem>>, %arg4: memref<1x128xf32, #tpu.memory_space<vmem>>, %arg5: memref<1x16x128xbf16, #tpu.memory_space<vmem>>) attributes {dimension_semantics = [#tpu.dimension_semantics<parallel>, #tpu.dimension_semantics<parallel>], iteration_bounds = array<i64: 2, 1>, scalar_prefetch = 0 : i64, scratch_operands = 0 : i64, tpu.core_type = #tpu.core_type<tc>, window_params = [{transform_indices = @transform_0, window_bounds = array<i64: 1, 16, 192>}, {pipeline_mode = #tpu.pipeline_mode<synchronous>, transform_indices = @transform_1, window_bounds = array<i64: 192, 128>}, {pipeline_mode = #tpu.pipeline_mode<synchronous>, transform_indices = @transform_2, window_bounds = array<i64: 1, 128>}, {transform_indices = @transform_3, window_bounds = array<i64: 1, 16, 128>}]} {
    %c0 = arith.constant 0 : index
    %c0_0 = arith.constant 0 : index
    %c0_1 = arith.constant 0 : index
    %0 = vector.load %arg2[%c0, %c0_0, %c0_1] : memref<1x16x192xbf16, #tpu.memory_space<vmem>>, vector<1x16x192xbf16>
    %1 = vector.shape_cast %0 : vector<1x16x192xbf16> to vector<16x192xbf16>
    %c0_2 = arith.constant 0 : index
    %c0_3 = arith.constant 0 : index
    %2 = vector.load %arg3[%c0_2, %c0_3] : memref<192x128xbf16, #tpu.memory_space<vmem>>, vector<192x128xbf16>
    %cst = arith.constant dense<0.000000e+00> : vector<16x128xf32>
    %3 = tpu.matmul %1, %2, %cst {dimension_numbers = #tpu.dot_dimension_numbers<[1], [0], [0], [1], [0, 0, 1, 1], [], []>} : vector<16x192xbf16>, vector<192x128xbf16>, vector<16x128xf32> -> vector<16x128xf32>
    %c0_4 = arith.constant 0 : index
    %c0_5 = arith.constant 0 : index
    %4 = vector.load %arg4[%c0_4, %c0_5] : memref<1x128xf32, #tpu.memory_space<vmem>>, vector<1x128xf32>
    %5 = vector.shape_cast %4 : vector<1x128xf32> to vector<128xf32>
    %6 = vector.shape_cast %5 : vector<128xf32> to vector<1x128xf32>
    %7 = vector.broadcast %6 : vector<1x128xf32> to vector<16x128xf32>
    %8 = arith.addf %3, %7 : vector<16x128xf32>
    %cst_6 = arith.constant 0.000000e+00 : f32
    %9 = vector.broadcast %cst_6 : f32 to vector<16x128xf32>
    %10 = arith.maximumf %8, %9 : vector<16x128xf32>
    %11 = arith.truncf %10 : vector<16x128xf32> to vector<16x128xbf16>
    %c0_7 = arith.constant 0 : index
    %c0_8 = arith.constant 0 : index
    %c0_9 = arith.constant 0 : index
    %12 = vector.load %arg5[%c0_7, %c0_8, %c0_9] : memref<1x16x128xbf16, #tpu.memory_space<vmem>>, vector<1x16x128xbf16>
    %13 = vector.shape_cast %12 : vector<1x16x128xbf16> to vector<16x128xbf16>
    %14 = vector.shape_cast %11 : vector<16x128xbf16> to vector<1x16x128xbf16>
    tpu.vector_store %arg5[%c0_7, %c0_8, %c0_9], %14 {strides = array<i32>} : memref<1x16x128xbf16, #tpu.memory_space<vmem>>, vector<1x16x128xbf16>,
    return
  }
  func.func @transform_0(%arg0: i32, %arg1: i32) -> (i32, i32, i32) {
    %c0_i32 = arith.constant 0 : i32
    %c0_i32_0 = arith.constant 0 : i32
    return %arg0, %arg1, %c0_i32 : i32, i32, i32
  }
  func.func @transform_1(%arg0: i32, %arg1: i32) -> (i32, i32) {
    %c0_i32 = arith.constant 0 : i32
    %c0_i32_0 = arith.constant 0 : i32
    %c0_i32_1 = arith.constant 0 : i32
    return %c0_i32, %c0_i32_0 : i32, i32
  }
  func.func @transform_2(%arg0: i32, %arg1: i32) -> (i32, i32) {
    %c0_i32 = arith.constant 0 : i32
    %c0_i32_0 = arith.constant 0 : i32
    %c0_i32_1 = arith.constant 0 : i32
    return %c0_i32, %c0_i32_0 : i32, i32
  }
  func.func @transform_3(%arg0: i32, %arg1: i32) -> (i32, i32, i32) {
    %c0_i32 = arith.constant 0 : i32
    %c0_i32_0 = arith.constant 0 : i32
    return %arg0, %arg1, %c0_i32 : i32, i32, i32
  }
}

</mosaic_0001>

<bundles_post_ra>
// kernel: tpu_custom_call.1
= control target key start
LH: loop header
LB: loop body
LE: loop exit
PB: predicated region body
PF: predicated region fallthrough
CT: control target
= control target key end

     0   :  { %s1003_s0 = inlined_call_operand.hbm [shape: bf16[2,16,192], index: 0, kind: input, shape index: {}]   ;;  %s1004_s1 = inlined_call_operand.hbm [shape: bf16[192,128], index: 1, kind: input, shape index: {}]   ;;  %s1005_s2 = inlined_call_operand.vmem [shape: f32[1,128], index: 2, kind: input, shape index: {}]   ;;  %s1006_s3 = inlined_call_operand.hbm [shape: bf16[2,16,128], index: 3, kind: output, shape index: {}]  }
   0x1   :  { %1007 = sst [smem:[#allocation11_spill]] %s1004_s1 }
   0x2   :  { %8 = vsyncpa [#allocation3], 0 }
   0x3   :  { %10 = vsyncpa [#allocation3 + $0x1], 0 }
   0x4   :  { %11 = vsyncpa [#allocation6], 0 }
   0x5   :  { %12 = vsyncpa [#allocation4], 0 }
   0x6   :  { %14 = vsyncpa [#allocation4 + $0x1], 0  ;;  %s844_s12 = smov 0   ;;  %s846_s13 = smov 0  }
   0x7   :  { %s848_s14 = smov 0   ;;  %s850_s15 = smov 0  }
   0x8   :  { %s852_s16 = smov 0   ;;  %s854_s17 = smov 0  }
   0x9 LB: > { %s494_s18 = sadd.s32 4294967295, %s815_s17   ;;  %s495_s19 = sadd.s32 4294967294, %s815_s17   ;;  %s815_s17 = sphi %s854_s17, %s20_s17   ;;  %s811_s16 = sphi %s852_s16, %s1020_s16   ;;  %s807_s15 = sphi %s850_s15, %s1019_s15   ;;  %s803_s14 = sphi %s848_s14, %s1018_s14   ;;  %s799_s13 = sphi %s846_s13, %s1017_s13   ;;  %s795_s12 = sphi %s844_s12, %s1016_s12  }
   0xa   : > { %p54_p0 = scmp.ne.s32.totalorder %s799_s13, %s795_s12  ;;  %p878_p1 = scmp.eq.s32.totalorder %s494_s18, 0 }
   0xb   : > { %p882_p2 = scmp.eq.s32.totalorder %s494_s18, 1  ;;  %p128_p3 = scmp.eq.s32.totalorder %s495_s19, 1 }
   0xc   : > { %p888_p4 = por %p878_p1, %p54_p0  ;;  %p496_p5 = scmp.ge.s32.totalorder %s815_s17, 1 }
   0xd   : > { %p893_p6 = por %p128_p3, %p54_p0  ;;  %p135_p7 = scmp.lt.s32.totalorder %s815_s17, 3 }
   0xe   : > { %s1012_s1 = sld [smem:[#allocation11_spill]]  ;;  %s817_s28 = smov [#allocation5]  }
   0xf   : > { %p901_p8 = pnand %p496_p5, %p135_p7  ;;  %s148_s29 = sshll.u32 %s817_s28, 4  ;;  %s149_s29 = int_to_ptr.vmem [resolvable:$true] %s148_s29 }
  0x10   : > { %p498_p11 = scmp.ge.s32.totalorder %s815_s17, 2  ;;  %s818_s30 = smov 64  }
  0x11   : > { %p597_p9 = pneg %p901_p8  ;;  %s819_s4 = smov 4  }
  0x12   : > { %s32_s5 = sadd.s32 1, %s811_s16  ;;  %s41_s6 = sadd.s32 1, %s803_s14 }
  0x13   : > { %p598_p10 = pnand %p597_p9, %p878_p1  ;;  %p34_p12 = scmp.ge.s32.totalorder %s32_s5, 2 }
  0x14   : > { %s146_s26 = sshll.u32 %s1012_s1, 4  ;;  %p48_p13 = scmp.ne.s32.totalorder %s803_s14, %s799_s13  ;;  %s147_s26 = int_to_ptr.hbm [resolvable:$true] %s146_s26 }
  0x15   : > { %600 = dma.hbm_to_vmem [thread:$0]  (!%p598_p10), %s147_s26, 1536, %s149_s29, [#allocation6], %s818_s30, %s818_s30, %s819_s4  }
  0x16   : > { %p49_p0 = scmp.eq.s32.totalorder %s815_s17, 0  ;;  %s1022_s5 = smov (%p34_p12, %s32_s5), 0 }
  0x17   : > { %p923_p5 = por %p882_p2, %p48_p13  ;;  %s36_s9 = ssub.s32 %s811_s16, %s1022_s5 }
  0x18   : > { %p917_p3 = por %p49_p0, %p48_p13  ;;  %p610_p7 = scmp.lt.s32.totalorder %s815_s17, 2 }
  0x19   : > { %p39_p9 = scmp.eq.s32.totalorder %s36_s9, 0  ;;  %s165_s10 = sand.u32 1, %s803_s14  }
  0x1a   : > { %s499_s11 = sshll.u32 %s165_s10, 4  ;;  %s568_s19 = sshll.u32 %s811_s16, 4 }
  0x1b   : > { %s932_s18 = scalar_select %p39_p9, %s803_s14, %s41_s6  }
  0x1c   : > { %s177_s26 = scalar_lea.hbm %s1003_s0, %s568_s19  ;;  %s169_s28 = scalar_lea.vmem [#allocation2], %s499_s11 }
  0x1d   : > { %s180_s29 = sshll.u32 %s169_s28, 4  ;;  %s178_s21 = sshll.u32 %s177_s26, 4  ;;  %s181_s29 = int_to_ptr.vmem [resolvable:$true] %s180_s29  ;;  %s179_s21 = int_to_ptr.hbm [resolvable:$true] %s178_s21 }
  0x1e   : > { %p602_p2 = pnand %p610_p7, %p917_p3  ;;  %s166_s30 = scalar_lea.sflag [#allocation3], %s165_s10 }
  0x1f   : > { %s820_s4 = smov 128   ;;  %s821_s1 = smov 8  }
  0x20   : > { %604 = dma.hbm_to_vmem [thread:$0]  (!%p602_p2), %s179_s21, 256, %s181_s29, %s166_s30, %s820_s4, %s820_s4, %s821_s1  }
  0x21   : > { %192 = sbr.rel (%p901_p8) target bundleno = 219 (0xdb), region = 32  ;;  %s943_s6 = sand.u32 (!%p901_p8), 1, %s799_s13  }
  0x22   : > { %s503_s9 = sshll.u32 (!%p901_p8), %s943_s6, 4  ;;  %s195_s11 = scalar_lea.sflag (!%p901_p8), [#allocation3], %s943_s6 }
  0x23   : > { %s947_s19 = scalar_lea.vmem (!%p901_p8), [#allocation2], %s503_s9 }
  0x26   : > { %782 = dma.done.wait (%p888_p4), %s195_s11, 256  }
  0x27   : > { %784 = vsyncadd (%p888_p4), %s195_s11, 4294967040 }
  0x28   : > { %786 = dma.done.wait (%p878_p1), [#allocation6], 1536  }
  0x29   : > { %788 = vsyncadd (%p878_p1), [#allocation6], 4294965760  ;;  %v578_v0 = vld [vmem:[#allocation5 + $0x38] sm:$0xff]  ;;  %v577_v2 = vld [vmem:[#allocation5 + $0x30] sm:$0xff]  ;;  %vm341_vm0 = vcmask 523264   ;;  %s505_s22 = sshll.u32 %s943_s6, 3 }
  0x2a   : > { %v582_v1 = vld [vmem:[#allocation5 + $0x58] sm:$0xff]  ;;  %345 = vmatpush.bf16.msra.mxu0 %v578_v0  ;;  %v581_v3 = vld [vmem:[#allocation5 + $0x50] sm:$0xff]  ;;  %v576_v4 = vld [vmem:[#allocation5 + $0x28] sm:$0xff]  ;;  %s583_s27 = sshll.u32 %s807_s15, 3  ;;  %s226_s25 = scalar_lea.vmem [#allocation7], %s505_s22 }
  0x2b   : > { %363 = vmatpush.bf16.msra.mxu1 %v582_v1  ;;  %v580_v5 = vld [vmem:[#allocation5 + $0x48] sm:$0xff]  ;;  %v575_v6 = vld [vmem:[#allocation5 + $0x20] sm:$0xff]  ;;  %v574_v10 = vld [vmem:[#allocation5 + $0x18] sm:$0xff]  ;;  %s393_s24 = scalar_lea.hbm %s1006_s3, %s583_s27  ;;  %s394_s26 = sshll.u32 %s226_s25, 4  ;;  %s395_s26 = int_to_ptr.vmem [resolvable:$true] %s394_s26 }
  0x2c   : > { %v579_v7 = vld [vmem:[#allocation5 + $0x40] sm:$0xff]  ;;  %v510_v9 = vld [vmem:[%s947_s19 + $0x8] sm:$0xf0]  ;;  %v573_v12 = vld [vmem:[#allocation5 + $0x10] sm:$0xff]  ;;  %s396_s28 = sshll.u32 %s393_s24, 4  ;;  %s380_s15 = scalar_lea.sflag [#allocation4], %s943_s6  ;;  %s397_s28 = int_to_ptr.hbm [resolvable:$true] %s396_s28 }
  0x2d   : > { %v569_v8 = vld [vmem:[%s947_s19 + $0x4] sm:$0xf]  ;;  %v572_v13 = vld [vmem:[#allocation5 + $0x8] sm:$0xff]  ;;  %v508_v15 = vld [vmem:[%s947_s19] sm:$0xf]  ;;  %s743_s29 = sshra.s32 %s397_s28, 4  ;;  %s744_s29 = int_to_ptr.hbm [resolvable:$true] %s743_s29 }
  0x2e   : > { %346 = vmatpush.bf16.msra.mxu0 %v577_v2  ;;  %v513_v11 = vor.u32 %v569_v8, %v510_v9  ;;  %v571_v14 = vld [vmem:[#allocation5] sm:$0xff]  ;;  %v570_v16 = vld [vmem:[%s947_s19 + $0x4] sm:$0xf0]  ;;  %s745_s21 = scalar_lea.hbm %s744_s29, 8  ;;  %s749_s9 = scalar_lea.hbm %s1006_s3, 16 }
  0x2f   : > { %364 = vmatpush.bf16.msra.mxu1 %v581_v3  ;;  %v509_v17 = vor.u32 %v570_v16, %v508_v15  ;;  %v668_v20 = vld [vmem:[%s1005_s2] ss:$0 sm:$0xff]  ;;  %p746_p1 = scmp.ne.s32.totalorder %s744_s29, %s745_s21  ;;  %p750_p10 = scmp.lt.s32.totalorder %s744_s29, %s1006_s3 }
  0x30   : > { %p751_p12 = scmp.lt.s32.totalorder %s749_s9, %s745_s21 }
  0x31   : > { %p747_p4 = pnand %p746_p1, %p923_p5 }
  0x32   : > { %347 = vmatpush.bf16.msra.mxu0 %v576_v4  ;;  %p752_p13 = por %p751_p12, %p750_p10 }
  0x33   : > { %365 = vmatpush.bf16.msra.mxu1 %v580_v5  ;;  %p748_p8 = pneg %p747_p4 }
  0x35   : > { %p753_p0 = pnand %p752_p13, %p748_p8 }
  0x36   : > { %348 = vmatpush.bf16.msra.mxu0 %v575_v6 }
  0x37   : > { %366 = vmatpush.bf16.msra.mxu1 %v579_v7 }
  0x3a   : > { %349 = vmatpush.bf16.msra.mxu0 %v574_v10  ;;  %562 = vmatmul.msk.bf16.vlgmr.msra.gmra.mxu1 %vm341_vm0, %v513_v11 }
  0x3e   : > { %350 = vmatpush.bf16.msra.mxu0 %v573_v12 }
  0x42   : > { %351 = vmatpush.bf16.msra.mxu0 %v572_v13 }
  0x46   : > { %352 = vmatpush.bf16.msra.mxu0 %v571_v14 }
  0x49   : > { %353 = vmatmul.bf16.vlgmr.msra.gmra.mxu0 %v509_v17 }
  0xb7   : > { %v368_v18 = vpop.f32.mrf.mxu1 }
  0xbf   : > { %v370_v25 = vpop.f32.mrf.mxu1 }
  0xc6   : > { %v354_v19 = vpop.f32.mrf.mxu0 }
  0xc7   : > { %v355_v21 = vadd.f32 %v668_v20, %v354_v19 }
  0xc9   : > { %v369_v23 = vadd.f32 %v368_v18, %v355_v21 }
  0xcb   : > { %v373_v27 = vmax.f32 %v369_v23, 0.0 }
  0xce   : > { %v356_v22 = vpop.f32.mrf.mxu0 }
  0xcf   : > { %v357_v24 = vadd.f32 %v668_v20, %v356_v22 }
  0xd1   : > { %v371_v26 = vadd.f32 %v370_v25, %v357_v24 }
  0xd3   : > { %v374_v28 = vmax.f32 %v371_v26, 0.0 }
  0xd5   : > { %v587_v29 = vpack.c.bf16 %v374_v28, %v373_v27 }
  0xd7   : > { %588 = vst [vmem:[%s226_s25] sm:$0xff] %v587_v29  }
  0xd8   : > { %756 = shalt.err (!%p753_p0)
}
  0xd9   : > { %s822_s6 = smov 64   ;;  %s823_s1 = smov 4  }
  0xda   : > { %595 = dma.vmem_to_hbm [thread:$0]  (%p923_p5), %s395_s26, 128, %s397_s28, %s380_s15, %s822_s6, %s822_s6, %s823_s1  }
  0xdb PF: > { %s411_s20 = sand.u32 1, %s795_s12   ;;  %p606_p3 = pnand %p498_p11, %p893_p6 }
  0xdc   : > { %s412_s22 = scalar_lea.sflag [#allocation4], %s411_s20 }
  0xdd   : > { %p607_p7 = pneg %p606_p3 }
  0xdf   : > { %790 = dma.done.wait (%p607_p7), %s412_s22, 128  }
  0xe0   : > { %792 = vsyncadd (%p607_p7), %s412_s22, 4294967168  ;;  %s20_s17 = sadd.s32 1, %s815_s17   ;;  %s1016_s12 = smov %s799_s13 }
  0xe1   : > { %p17_p9 = scmp.ge.s32.totalorder %s20_s17, 4   ;;  %s1017_s13 = smov %s803_s14 }
  0xe2   : > { %s1018_s14 = smov %s932_s18  ;;  %s1019_s15 = smov %s811_s16 }
  0xe3   : > { %s1020_s16 = smov %s1022_s5  ;;  %19 = sbr.rel (!%p17_p9) target bundleno = 9 (0x9), region = 81 }
  0xe8   :  { %418 = vsyncpa [#allocation3], 1 }
  0xe9   :  { %420 = vsyncpa [#allocation3 + $0x1], 1 }
  0xea   :  { %421 = vsyncpa [#allocation6], 1 }
  0xeb   :  { %422 = vsyncpa [#allocation4], 1 }
  0xec   :  { %424 = vsyncpa [#allocation4 + $0x1], 1 }

</bundles_post_ra>
